<compile_context>
chip_gen: v5e
topology: v5e:2x2
jax: 0.10.0
libtpu: 0.0.40
codegen_flags: <defaults>
</compile_context>

<pallas_src>
import jax
import jax.numpy as jnp
from jax.experimental import pallas as pl
from jax.experimental.pallas import tpu as pltpu

LANE = 128
SUBLANE = 8


def _round_up(n, m):
    return ((n + m - 1) // m) * m


def encoder_kernel(x_ref, w1_ref, b1_ref, w2_ref, b2_ref, mu_ref):
    # x_ref : [TB, D]  f32   (batch tile)
    # w1_ref: [D, HP]  bf16  (resident)     b1_ref: [1, HP] f32
    # w2_ref: [HP, L]  bf16  (resident)     b2_ref: [1, L]  f32
    # mu_ref: [TB, L]  f32
    x_bf = x_ref[...].astype(jnp.bfloat16)          # per-tile cast on the VPU
    h = jnp.dot(x_bf, w1_ref[...], preferred_element_type=jnp.float32)
    h = jnp.maximum(h + b1_ref[...], 0.0)           # bias + ReLU in f32
    mu = jnp.dot(h.astype(jnp.bfloat16), w2_ref[...],
                 preferred_element_type=jnp.float32) + b2_ref[...]
    mu_ref[...] = mu.astype(mu_ref.dtype)


def deterministic_encoder(x, params, *, block_b=1024):
    """x: [B, C, H, W] float32 -> mu: [B, latent_dim] float32."""
    w1, b1, w2, b2 = params
    B = x.shape[0]
    D, Hd = w1.shape
    L = w2.shape[1]
    x_flat = x.reshape(B, D)                         # row-major == torch .view(B, -1)

    # Lane-dense padding of the hidden dim only (zeros -> numerically exact).
    HP = _round_up(Hd, LANE)
    w1p = jnp.zeros((D, HP), jnp.float32).at[:, :Hd].set(w1).astype(jnp.bfloat16)
    b1p = jnp.zeros((1, HP), jnp.float32).at[:, :Hd].set(b1.reshape(1, Hd))
    w2p = jnp.zeros((HP, L), jnp.float32).at[:Hd, :].set(w2).astype(jnp.bfloat16)
    b2p = b2.reshape(1, L).astype(jnp.float32)

    # Batch tile: whole batch in one block if it fits (block == full array dim is
    # always a legal block shape); otherwise a sublane-aligned tile with an
    # uneven (cdiv) grid -- no jnp.pad copy of x.
    if B <= block_b:
        TB = B
    else:
        TB = _round_up(block_b, SUBLANE)
    grid = (pl.cdiv(B, TB),)

    # Advisory cost with real (unpadded) dims: the kernel is HBM-bound on x.
    cost = pl.CostEstimate(
        flops=2 * B * (D * Hd + Hd * L),
        bytes_accessed=(B * D * 4                    # x (f32, read in-kernel)
                        + D * HP * 2 + HP * 4        # W1 (bf16) + b1
                        + HP * L * 2 + L * 4         # W2 (bf16) + b2
                        + B * L * 4),                # mu (f32, un-padded)
        transcendentals=0,
    )

    # VMEM footprint: 2x f32 x-tile + 2x mu-tile + double-buffered resident weights.
    vmem_bytes = (2 * TB * D * 4 + 2 * TB * L * 4
                  + 2 * (D * HP * 2 + HP * 4 + HP * L * 2 + L * 4))
    cp_kwargs = dict(dimension_semantics=("parallel",))   # megacore over the batch grid
    if vmem_bytes > 12 * 1024 * 1024:                      # headroom vs v5e's 16 MiB default
        cp_kwargs["vmem_limit_bytes"] = min(vmem_bytes + (4 << 20), 48 << 20)

    mu = pl.pallas_call(
        encoder_kernel,
        out_shape=jax.ShapeDtypeStruct((B, L), jnp.float32),
        grid=grid,
        in_specs=[
            pl.BlockSpec((TB, D), lambda i: (i, 0)),       # x: tiled over batch
            pl.BlockSpec((D, HP), lambda i: (0, 0)),       # W1: resident
            pl.BlockSpec((1, HP), lambda i: (0, 0)),       # b1: resident
            pl.BlockSpec((HP, L), lambda i: (0, 0)),       # W2: resident
            pl.BlockSpec((1, L), lambda i: (0, 0)),        # b2: resident
        ],
        out_specs=pl.BlockSpec((TB, L), lambda i: (i, 0)),  # un-padded mu
        compiler_params=pltpu.CompilerParams(**cp_kwargs),
        cost_estimate=cost,
    )(x_flat, w1p, b1p, w2p, b2p)

    return mu


def init_params(key, in_dim, hidden_dim, latent_dim):
    k1, k2, k3, k4 = jax.random.split(key, 4)
    w1 = jax.random.normal(k1, (in_dim, hidden_dim), jnp.float32) * (2.0 / in_dim) ** 0.5
    b1 = jax.random.normal(k2, (1, hidden_dim), jnp.float32) * 0.01
    w2 = jax.random.normal(k3, (hidden_dim, latent_dim), jnp.float32) * (1.0 / hidden_dim) ** 0.5
    b2 = jax.random.normal(k4, (1, latent_dim), jnp.float32) * 0.01
    return w1, b1, w2, b2


if __name__ == "__main__":
    key = jax.random.PRNGKey(0)
    kx, kp = jax.random.split(key)

    B, C, H, W = 2, 4, 16, 16            # NCHW input, as the PyTorch module sees it
    hidden_dim, latent_dim = 32, 8
    in_dim = C * H * W

    x = jax.random.normal(kx, (B, C, H, W), jnp.float32)
    params = init_params(kp, in_dim, hidden_dim, latent_dim)

    mu = deterministic_encoder(x, params)
    jax.block_until_ready(mu)
    assert mu.shape == (B, latent_dim)

    # Tight check vs. a reference using the same bf16-operand / f32-accumulate casts.
    w1, b1, w2, b2 = params
    xb = x.reshape(B, -1).astype(jnp.bfloat16)
    h_ref = jnp.maximum(
        jnp.dot(xb, w1.astype(jnp.bfloat16), preferred_element_type=jnp.float32) + b1, 0.0)
    mu_ref_bf = jnp.dot(h_ref.astype(jnp.bfloat16), w2.astype(jnp.bfloat16),
                        preferred_element_type=jnp.float32) + b2
    assert jnp.allclose(mu, mu_ref_bf, atol=5e-3, rtol=5e-3)

    # Loose check vs. the full-f32 module semantics (intentional bf16 trade-off).
    mu_ref_f32 = jnp.maximum(x.reshape(B, -1) @ w1 + b1, 0.0) @ w2 + b2
    assert jnp.allclose(mu, mu_ref_f32, atol=5e-2, rtol=5e-2)

    print("KERNEL_OK")
</pallas_src>

<mosaic_0001>
module attributes {stable_mosaic.version = 11 : i64} {
  func.func @encoder_kernel(%arg0: i32, %arg1: memref<2x1024xf32, #tpu.memory_space<vmem>>, %arg2: memref<1024x128xbf16, #tpu.memory_space<vmem>>, %arg3: memref<1x128xf32, #tpu.memory_space<vmem>>, %arg4: memref<128x8xbf16, #tpu.memory_space<vmem>>, %arg5: memref<1x8xf32, #tpu.memory_space<vmem>>, %arg6: memref<2x8xf32, #tpu.memory_space<vmem>>) attributes {dimension_semantics = [#tpu.dimension_semantics<parallel>], iteration_bounds = array<i64: 1>, scalar_prefetch = 0 : i64, scratch_operands = 0 : i64, tpu.core_type = #tpu.core_type<tc>, window_params = [{transform_indices = @transform_0, window_bounds = array<i64: 2, 1024>}, {pipeline_mode = #tpu.pipeline_mode<synchronous>, transform_indices = @transform_1, window_bounds = array<i64: 1024, 128>}, {pipeline_mode = #tpu.pipeline_mode<synchronous>, transform_indices = @transform_2, window_bounds = array<i64: 1, 128>}, {pipeline_mode = #tpu.pipeline_mode<synchronous>, transform_indices = @transform_3, window_bounds = array<i64: 128, 8>}, {pipeline_mode = #tpu.pipeline_mode<synchronous>, transform_indices = @transform_4, window_bounds = array<i64: 1, 8>}, {transform_indices = @transform_5, window_bounds = array<i64: 2, 8>}]} {
    %c0 = arith.constant 0 : index
    %c0_0 = arith.constant 0 : index
    %0 = vector.load %arg1[%c0, %c0_0] : memref<2x1024xf32, #tpu.memory_space<vmem>>, vector<2x1024xf32>
    %1 = arith.truncf %0 : vector<2x1024xf32> to vector<2x1024xbf16>
    %c0_1 = arith.constant 0 : index
    %c0_2 = arith.constant 0 : index
    %2 = vector.load %arg2[%c0_1, %c0_2] : memref<1024x128xbf16, #tpu.memory_space<vmem>>, vector<1024x128xbf16>
    %cst = arith.constant dense<0.000000e+00> : vector<2x128xf32>
    %3 = tpu.matmul %1, %2, %cst {dimension_numbers = #tpu.dot_dimension_numbers<[1], [0], [0], [1], [0, 0, 1, 1], [], []>} : vector<2x1024xbf16>, vector<1024x128xbf16>, vector<2x128xf32> -> vector<2x128xf32>
    %c0_3 = arith.constant 0 : index
    %c0_4 = arith.constant 0 : index
    %4 = vector.load %arg3[%c0_3, %c0_4] : memref<1x128xf32, #tpu.memory_space<vmem>>, vector<1x128xf32>
    %5 = vector.broadcast %4 : vector<1x128xf32> to vector<2x128xf32>
    %6 = arith.addf %3, %5 : vector<2x128xf32>
    %cst_5 = arith.constant 0.000000e+00 : f32
    %7 = vector.broadcast %cst_5 : f32 to vector<2x128xf32>
    %8 = arith.maximumf %6, %7 : vector<2x128xf32>
    %9 = arith.truncf %8 : vector<2x128xf32> to vector<2x128xbf16>
    %c0_6 = arith.constant 0 : index
    %c0_7 = arith.constant 0 : index
    %10 = vector.load %arg4[%c0_6, %c0_7] : memref<128x8xbf16, #tpu.memory_space<vmem>>, vector<128x8xbf16>
    %cst_8 = arith.constant dense<0.000000e+00> : vector<2x8xf32>
    %11 = tpu.matmul %9, %10, %cst_8 {dimension_numbers = #tpu.dot_dimension_numbers<[1], [0], [0], [1], [0, 0, 1, 1], [], []>} : vector<2x128xbf16>, vector<128x8xbf16>, vector<2x8xf32> -> vector<2x8xf32>
    %c0_9 = arith.constant 0 : index
    %c0_10 = arith.constant 0 : index
    %12 = vector.load %arg5[%c0_9, %c0_10] : memref<1x8xf32, #tpu.memory_space<vmem>>, vector<1x8xf32>
    %13 = vector.broadcast %12 : vector<1x8xf32> to vector<2x8xf32>
    %14 = arith.addf %11, %13 : vector<2x8xf32>
    %c0_11 = arith.constant 0 : index
    %c0_12 = arith.constant 0 : index
    %15 = vector.load %arg6[%c0_11, %c0_12] : memref<2x8xf32, #tpu.memory_space<vmem>>, vector<2x8xf32>
    tpu.vector_store %arg6[%c0_11, %c0_12], %14 {strides = array<i32>} : memref<2x8xf32, #tpu.memory_space<vmem>>, vector<2x8xf32>,
    return
  }
  func.func @transform_0(%arg0: i32) -> (i32, i32) {
    %c0_i32 = arith.constant 0 : i32
    %c0_i32_0 = arith.constant 0 : i32
    return %arg0, %c0_i32 : i32, i32
  }
  func.func @transform_1(%arg0: i32) -> (i32, i32) {
    %c0_i32 = arith.constant 0 : i32
    %c0_i32_0 = arith.constant 0 : i32
    %c0_i32_1 = arith.constant 0 : i32
    return %c0_i32, %c0_i32_0 : i32, i32
  }
  func.func @transform_2(%arg0: i32) -> (i32, i32) {
    %c0_i32 = arith.constant 0 : i32
    %c0_i32_0 = arith.constant 0 : i32
    %c0_i32_1 = arith.constant 0 : i32
    return %c0_i32, %c0_i32_0 : i32, i32
  }
  func.func @transform_3(%arg0: i32) -> (i32, i32) {
    %c0_i32 = arith.constant 0 : i32
    %c0_i32_0 = arith.constant 0 : i32
    %c0_i32_1 = arith.constant 0 : i32
    return %c0_i32, %c0_i32_0 : i32, i32
  }
  func.func @transform_4(%arg0: i32) -> (i32, i32) {
    %c0_i32 = arith.constant 0 : i32
    %c0_i32_0 = arith.constant 0 : i32
    %c0_i32_1 = arith.constant 0 : i32
    return %c0_i32, %c0_i32_0 : i32, i32
  }
  func.func @transform_5(%arg0: i32) -> (i32, i32) {
    %c0_i32 = arith.constant 0 : i32
    %c0_i32_0 = arith.constant 0 : i32
    return %arg0, %c0_i32 : i32, i32
  }
}

</mosaic_0001>

<bundles_post_ra>
// kernel: tpu_custom_call.1
= control target key start
LH: loop header
LB: loop body
LE: loop exit
PB: predicated region body
PF: predicated region fallthrough
CT: control target
= control target key end

     0   :  { %10 = vsyncpa [#allocation3], 0  ;;  %s1284_s0 = inlined_call_operand.vmem [shape: f32[2,1024], index: 0, kind: input, shape index: {}]   ;;  %s1285_s1 = inlined_call_operand.hbm [shape: bf16[1024,128], index: 1, kind: input, shape index: {}]   ;;  %s1286_s2 = inlined_call_operand.vmem [shape: f32[1,128], index: 2, kind: input, shape index: {}]   ;;  %s1287_s3 = inlined_call_operand.vmem [shape: bf16[128,8], index: 3, kind: input, shape index: {}]   ;;  %s1288_s4 = inlined_call_operand.vmem [shape: f32[1,8], index: 4, kind: input, shape index: {}]   ;;  %s1289_s5 = inlined_call_operand.hbm [shape: f32[2,8], index: 5, kind: output, shape index: {}]  }
   0x1   :  { %11 = vsyncpa [#allocation4], 0  ;;  %s18_s20 = sshll.u32 %s1285_s1, 4  ;;  %s1208_s21 = smov [#allocation2]   ;;  %s19_s20 = int_to_ptr.hbm [resolvable:$true] %s18_s20 }
   0x2   :  { %s20_s22 = sshll.u32 %s1208_s21, 4  ;;  %s1209_s23 = smov 64   ;;  %s21_s22 = int_to_ptr.vmem [resolvable:$true] %s20_s22 }
   0x3   :  { %s1210_s24 = smov 4  }
   0x4   :  { %26 = dma.hbm_to_vmem [thread:$0]  %s19_s20, 8192, %s21_s22, [#allocation3], %s1209_s23, %s1209_s23, %s1210_s24  }
   0x5   :  { %1204 = dma.done.wait [#allocation3], 8192  }
   0x6   :  { %1205 = vsyncadd [#allocation3], 4294959104  ;;  %v1085_v0 = vld [vmem:[#allocation2 + $0x38] sm:$0xff]  ;;  %v1084_v4 = vld [vmem:[#allocation2 + $0x30] sm:$0xff]  ;;  %s1211_s20 = smov [#allocation5]   ;;  %s780_s24 = sshll.u32 %s1289_s5, 4  ;;  %s781_s24 = int_to_ptr.hbm [resolvable:$true] %s780_s24 }
   0x7   :  { %v1093_v1 = vld [vmem:[#allocation2 + $0x78] sm:$0xff]  ;;  %584 = vmatpush.bf16.msra.mxu0 %v1085_v0  ;;  %v1092_v5 = vld [vmem:[#allocation2 + $0x70] sm:$0xff]  ;;  %v1083_v8 = vld [vmem:[#allocation2 + $0x28] sm:$0xff]  ;;  %s778_s21 = sshll.u32 %s1211_s20, 4  ;;  %vm771_vm0 = vcmask 58368   ;;  %s779_s21 = int_to_ptr.vmem [resolvable:$true] %s778_s21 }
   0x8   :  { %v1101_v2 = vld [vmem:[#allocation2 + $0xb8] sm:$0xff]  ;;  %597 = vmatpush.bf16.msra.mxu1 %v1093_v1  ;;  %v1100_v6 = vld [vmem:[#allocation2 + $0xb0] sm:$0xff]  ;;  %v1091_v9 = vld [vmem:[#allocation2 + $0x68] sm:$0xff] }
   0x9   :  { %v1109_v3 = vld [vmem:[#allocation2 + $0xf8] sm:$0xff]  ;;  %610 = vmatpush.bf16.msra.mxu2 %v1101_v2  ;;  %v1108_v7 = vld [vmem:[#allocation2 + $0xf0] sm:$0xff]  ;;  %v1099_v10 = vld [vmem:[#allocation2 + $0xa8] sm:$0xff] }
   0xa   :  { %623 = vmatpush.bf16.msra.mxu3 %v1109_v3  ;;  %v1107_v11 = vld [vmem:[#allocation2 + $0xe8] sm:$0xff]  ;;  %v1082_v12 = vld [vmem:[#allocation2 + $0x20] sm:$0xff]  ;;  %v37_v16 = vld [vmem:[%s1284_s0] sm:$0xff] }
   0xb   :  { %585 = vmatpush.bf16.msra.mxu0 %v1084_v4  ;;  %v1090_v13 = vld [vmem:[#allocation2 + $0x60] sm:$0xff]  ;;  %v1081_v17 = vld [vmem:[#allocation2 + $0x18] sm:$0xff]  ;;  %41 = vst [vmem:[#allocation1] ss:$4 sm:$0xff] %v37_v16  ;;  %v1080_v21 = vld [vmem:[#allocation2 + $0x10] sm:$0xff] }
   0xc   :  { %598 = vmatpush.bf16.msra.mxu1 %v1092_v5  ;;  %v1098_v14 = vld [vmem:[#allocation2 + $0xa0] sm:$0xff]  ;;  %v1089_v18 = vld [vmem:[#allocation2 + $0x58] sm:$0xff]  ;;  %v1088_v22 = vld [vmem:[#allocation2 + $0x50] sm:$0xff] }
   0xd   :  { %611 = vmatpush.bf16.msra.mxu2 %v1100_v6  ;;  %v1106_v15 = vld [vmem:[#allocation2 + $0xe0] sm:$0xff]  ;;  %v1097_v19 = vld [vmem:[#allocation2 + $0x98] sm:$0xff]  ;;  %v1096_v23 = vld [vmem:[#allocation2 + $0x90] sm:$0xff] }
   0xe   :  { %624 = vmatpush.bf16.msra.mxu3 %v1108_v7  ;;  %v1105_v20 = vld [vmem:[#allocation2 + $0xd8] sm:$0xff]  ;;  %v1104_v24 = vld [vmem:[#allocation2 + $0xd0] sm:$0xff]  ;;  %v1079_v25 = vld [vmem:[#allocation2 + $0x8] sm:$0xff] }
   0xf   :  { %586 = vmatpush.bf16.msra.mxu0 %v1083_v8  ;;  %v1087_v26 = vld [vmem:[#allocation2 + $0x48] sm:$0xff]  ;;  %v38_v29 = vld [vmem:[%s1284_s0 + $0x8] sm:$0xff]  ;;  %v1117_v34 = vld [vmem:[#allocation2 + $0x138] sm:$0xff] }
  0x10   :  { %599 = vmatpush.bf16.msra.mxu1 %v1091_v9  ;;  %v1095_v27 = vld [vmem:[#allocation2 + $0x88] sm:$0xff]  ;;  %v1078_v30 = vld [vmem:[#allocation2] sm:$0xff]  ;;  %43 = vst [vmem:[#allocation1 + $0x20] ss:$4 sm:$0xff] %v38_v29  ;;  %v1125_v35 = vld [vmem:[#allocation2 + $0x178] sm:$0xff] }
  0x11   :  { %612 = vmatpush.bf16.msra.mxu2 %v1099_v10  ;;  %v1103_v28 = vld [vmem:[#allocation2 + $0xc8] sm:$0xff]  ;;  %v1086_v31 = vld [vmem:[#allocation2 + $0x40] sm:$0xff]  ;;  %v1133_v40 = vld [vmem:[#allocation2 + $0x1b8] sm:$0xff] }
  0x12   :  { %625 = vmatpush.bf16.msra.mxu3 %v1107_v11  ;;  %v1094_v32 = vld [vmem:[#allocation2 + $0x80] sm:$0xff]  ;;  %v46_v36 = vld.sshfl [vmem:[#allocation1 + $0x10] sm:$0xff pattern:$0x73625140]  ;;  %v1141_v41 = vld [vmem:[#allocation2 + $0x1f8] sm:$0xff] }
  0x13   :  { %587 = vmatpush.bf16.msra.mxu0 %v1082_v12  ;;  %v1102_v33 = vld [vmem:[#allocation2 + $0xc0] sm:$0xff]  ;;  %v44_v37 = vld.sshfl [vmem:[#allocation1] sm:$0xff pattern:$0x73625140]  ;;  %v62_v42 = vpack.c.bf16 %v46_v36, %v46_v36  ;;  %v1116_v46 = vld [vmem:[#allocation2 + $0x130] sm:$0xff] }
  0x14   :  { %600 = vmatpush.bf16.msra.mxu1 %v1090_v13  ;;  %v47_v38 = vld.sshfl [vmem:[#allocation1 + $0x18] sm:$0xff pattern:$0x73625140]  ;;  %v45_v39 = vld.sshfl [vmem:[#allocation1 + $0x8] sm:$0xff pattern:$0x73625140]  ;;  %v60_v43 = vpack.c.bf16 %v44_v37, %v44_v37 }
  0x15   :  { %613 = vmatpush.bf16.msra.mxu2 %v1098_v14  ;;  %v63_v44 = vpack.c.bf16 %v47_v38, %v47_v38  ;;  %v61_v45 = vpack.c.bf16 %v45_v39, %v45_v39  ;;  %v1124_v47 = vld [vmem:[#allocation2 + $0x170] sm:$0xff]  ;;  %v1115_v50 = vld [vmem:[#allocation2 + $0x128] sm:$0xff]  ;;  %v1114_v54 = vld [vmem:[#allocation2 + $0x120] sm:$0xff] }
  0x16   :  { %626 = vmatpush.bf16.msra.mxu3 %v1106_v15  ;;  %v1132_v48 = vld [vmem:[#allocation2 + $0x1b0] sm:$0xff]  ;;  %v1123_v51 = vld [vmem:[#allocation2 + $0x168] sm:$0xff]  ;;  %v1122_v55 = vld [vmem:[#allocation2 + $0x160] sm:$0xff] }
  0x17   :  { %588 = vmatpush.bf16.msra.mxu0 %v1081_v17  ;;  %v1140_v49 = vld [vmem:[#allocation2 + $0x1f0] sm:$0xff]  ;;  %v1131_v52 = vld [vmem:[#allocation2 + $0x1a8] sm:$0xff]  ;;  %v1130_v56 = vld [vmem:[#allocation2 + $0x1a0] sm:$0xff] }
  0x18   :  { %601 = vmatpush.bf16.msra.mxu1 %v1089_v18  ;;  %v1139_v53 = vld [vmem:[#allocation2 + $0x1e8] sm:$0xff]  ;;  %v1138_v57 = vld [vmem:[#allocation2 + $0x1e0] sm:$0xff]  ;;  %v1113_v58 = vld [vmem:[#allocation2 + $0x118] sm:$0xff] }
  0x19   :  { %614 = vmatpush.bf16.msra.mxu2 %v1097_v19  ;;  %v1121_v59 = vld [vmem:[#allocation2 + $0x158] sm:$0xff]  ;;  %v1112_v62 = vld [vmem:[#allocation2 + $0x110] sm:$0xff]  ;;  %v1111_v2 = vld [vmem:[#allocation2 + $0x108] sm:$0xff] }
  0x1a   :  { %627 = vmatpush.bf16.msra.mxu3 %v1105_v20  ;;  %v1129_v60 = vld [vmem:[#allocation2 + $0x198] sm:$0xff]  ;;  %v1120_v63 = vld [vmem:[#allocation2 + $0x150] sm:$0xff]  ;;  %v1119_v3 = vld [vmem:[#allocation2 + $0x148] sm:$0xff] }
  0x1b   :  { %589 = vmatpush.bf16.msra.mxu0 %v1080_v21  ;;  %v1137_v61 = vld [vmem:[#allocation2 + $0x1d8] sm:$0xff]  ;;  %v1128_v0 = vld [vmem:[#allocation2 + $0x190] sm:$0xff]  ;;  %v1127_v4 = vld [vmem:[#allocation2 + $0x188] sm:$0xff] }
  0x1c   :  { %602 = vmatpush.bf16.msra.mxu1 %v1088_v22  ;;  %v1136_v1 = vld [vmem:[#allocation2 + $0x1d0] sm:$0xff]  ;;  %v1135_v5 = vld [vmem:[#allocation2 + $0x1c8] sm:$0xff]  ;;  %v1110_v6 = vld [vmem:[#allocation2 + $0x100] sm:$0xff] }
  0x1d   :  { %615 = vmatpush.bf16.msra.mxu2 %v1096_v23  ;;  %v1118_v7 = vld [vmem:[#allocation2 + $0x140] sm:$0xff]  ;;  %v48_v10 = vld.sshfl [vmem:[#allocation1 + $0x20] sm:$0xff pattern:$0x73625140]  ;;  %v1149_v18 = vld [vmem:[%s1287_s3 + $0x38] sm:$0xff] }
  0x1e   :  { %628 = vmatpush.bf16.msra.mxu3 %v1104_v24  ;;  %v1126_v8 = vld [vmem:[#allocation2 + $0x180] sm:$0xff]  ;;  %v50_v12 = vld.sshfl [vmem:[#allocation1 + $0x30] sm:$0xff pattern:$0x73625140]  ;;  %v64_v14 = vpack.c.bf16 %v48_v10, %v48_v10  ;;  %v1146_v21 = vld [vmem:[%s1287_s3 + $0x20] sm:$0xff] }
  0x1f   :  { %590 = vmatpush.bf16.msra.mxu0 %v1079_v25  ;;  %v1134_v9 = vld [vmem:[#allocation2 + $0x1c0] sm:$0xff]  ;;  %v51_v13 = vld.sshfl [vmem:[#allocation1 + $0x38] sm:$0xff pattern:$0x73625140]  ;;  %v66_v16 = vpack.c.bf16 %v50_v12, %v50_v12  ;;  %v1148_v19 = vld [vmem:[%s1287_s3 + $0x30] sm:$0xff] }
  0x20   :  { %603 = vmatpush.bf16.msra.mxu1 %v1087_v26  ;;  %v49_v11 = vld.sshfl [vmem:[#allocation1 + $0x28] sm:$0xff pattern:$0x73625140]  ;;  %v67_v17 = vpack.c.bf16 %v51_v13, %v51_v13  ;;  %v1145_v22 = vld [vmem:[%s1287_s3 + $0x18] sm:$0xff]  ;;  %v1144_v24 = vld [vmem:[%s1287_s3 + $0x10] sm:$0xff] }
  0x21   :  { %616 = vmatpush.bf16.msra.mxu2 %v1095_v27  ;;  %v65_v15 = vpack.c.bf16 %v49_v11, %v49_v11  ;;  %v1147_v20 = vld [vmem:[%s1287_s3 + $0x28] sm:$0xff] }
  0x22   :  { %629 = vmatpush.bf16.msra.mxu3 %v1103_v28  ;;  %v1143_v26 = vld [vmem:[%s1287_s3 + $0x8] sm:$0xff] }
  0x23   :  { %591 = vmatpush.bf16.msra.mxu0 %v1078_v30  ;;  %v1142_v30 = vld [vmem:[%s1287_s3] sm:$0xff] }
  0x24   :  { %604 = vmatpush.bf16.msra.mxu1 %v1086_v31 }
  0x25   :  { %617 = vmatpush.bf16.msra.mxu2 %v1094_v32  ;;  %v1154_v32 = vld [vmem:[%s1286_s2] ss:$0 sm:$0xff] }
  0x26   :  { %630 = vmatpush.bf16.msra.mxu3 %v1102_v33  ;;  %592 = vmatmul.bf16.vlgmr.msra.gmra.mxu0 %v60_v43 }
  0x27   :  { %636 = vmatpush.bf16.msrb.mxu0 %v1117_v34  ;;  %605 = vmatmul.bf16.vlgmr.msra.gmra.mxu1 %v61_v45 }
  0x28   :  { %649 = vmatpush.bf16.msrb.mxu1 %v1125_v35  ;;  %618 = vmatmul.bf16.vlgmr.msra.gmra.mxu2 %v62_v42 }
  0x29   :  { %662 = vmatpush.bf16.msrb.mxu2 %v1133_v40  ;;  %631 = vmatmul.bf16.vlgmr.msra.gmra.mxu3 %v63_v44 }
  0x2a   :  { %675 = vmatpush.bf16.msrb.mxu3 %v1141_v41 }
  0x2b   :  { %637 = vmatpush.bf16.msrb.mxu0 %v1116_v46 }
  0x2c   :  { %650 = vmatpush.bf16.msrb.mxu1 %v1124_v47 }
  0x2d   :  { %663 = vmatpush.bf16.msrb.mxu2 %v1132_v48 }
  0x2e   :  { %676 = vmatpush.bf16.msrb.mxu3 %v1140_v49 }
  0x2f   :  { %638 = vmatpush.bf16.msrb.mxu0 %v1115_v50 }
  0x30   :  { %651 = vmatpush.bf16.msrb.mxu1 %v1123_v51 }
  0x31   :  { %664 = vmatpush.bf16.msrb.mxu2 %v1131_v52 }
  0x32   :  { %677 = vmatpush.bf16.msrb.mxu3 %v1139_v53  ;;  %v1155_v53 = vld [vmem:[%s1288_s4] ss:$0 sm:$0xff] }
  0x33   :  { %639 = vmatpush.bf16.msrb.mxu0 %v1114_v54 }
  0x34   :  { %652 = vmatpush.bf16.msrb.mxu1 %v1122_v55 }
  0x35   :  { %665 = vmatpush.bf16.msrb.mxu2 %v1130_v56 }
  0x36   :  { %678 = vmatpush.bf16.msrb.mxu3 %v1138_v57 }
  0x37   :  { %640 = vmatpush.bf16.msrb.mxu0 %v1113_v58 }
  0x38   :  { %653 = vmatpush.bf16.msrb.mxu1 %v1121_v59 }
  0x39   :  { %666 = vmatpush.bf16.msrb.mxu2 %v1129_v60 }
  0x3a   :  { %679 = vmatpush.bf16.msrb.mxu3 %v1137_v61 }
  0x3b   :  { %641 = vmatpush.bf16.msrb.mxu0 %v1112_v62 }
  0x3c   :  { %654 = vmatpush.bf16.msrb.mxu1 %v1120_v63 }
  0x3d   :  { %667 = vmatpush.bf16.msrb.mxu2 %v1128_v0 }
  0x3e   :  { %680 = vmatpush.bf16.msrb.mxu3 %v1136_v1 }
  0x3f   :  { %642 = vmatpush.bf16.msrb.mxu0 %v1111_v2 }
  0x40   :  { %655 = vmatpush.bf16.msrb.mxu1 %v1119_v3 }
  0x41   :  { %668 = vmatpush.bf16.msrb.mxu2 %v1127_v4 }
  0x42   :  { %681 = vmatpush.bf16.msrb.mxu3 %v1135_v5 }
  0x43   :  { %643 = vmatpush.bf16.msrb.mxu0 %v1110_v6 }
  0x44   :  { %656 = vmatpush.bf16.msrb.mxu1 %v1118_v7 }
  0x45   :  { %669 = vmatpush.bf16.msrb.mxu2 %v1126_v8 }
  0x46   :  { %682 = vmatpush.bf16.msrb.mxu3 %v1134_v9  ;;  %644 = vmatmul.bf16.vlgmr.msrb.gmra.mxu0 %v64_v14 }
  0x47   :  { %657 = vmatmul.bf16.vlgmr.msrb.gmra.mxu1 %v65_v15  ;;  %758 = vmatpush.bf16.msra.mxu0 %v1149_v18 }
  0x48   :  { %670 = vmatmul.bf16.vlgmr.msrb.gmra.mxu2 %v66_v16 }
  0x49   :  { %683 = vmatmul.bf16.vlgmr.msrb.gmra.mxu3 %v67_v17 }
  0x4b   :  { %759 = vmatpush.bf16.msra.mxu0 %v1148_v19 }
  0x4f   :  { %760 = vmatpush.bf16.msra.mxu0 %v1147_v20 }
  0x53   :  { %761 = vmatpush.bf16.msra.mxu0 %v1146_v21 }
  0x57   :  { %762 = vmatpush.bf16.msra.mxu0 %v1145_v22 }
  0x5b   :  { %763 = vmatpush.bf16.msra.mxu0 %v1144_v24 }
  0x5f   :  { %764 = vmatpush.bf16.msra.mxu0 %v1143_v26 }
  0x63   :  { %765 = vmatpush.bf16.msra.mxu0 %v1142_v30 }
  0xa3   :  { %v593_v23 = vpop.f32.mrf.mxu0 }
  0xa4   :  { %v606_v25 = vpop.f32.mrf.mxu1  ;;  %v594_v35 = vadd.f32 %v1154_v32, %v593_v23 }
  0xa6   :  { %v607_v36 = vadd.f32 %v606_v25, %v594_v35 }
  0xab   :  { %v619_v27 = vpop.f32.mrf.mxu2  ;;  %v595_v29 = vpop.f32.mrf.mxu0 }
  0xac   :  { %v632_v28 = vpop.f32.mrf.mxu3  ;;  %v608_v31 = vpop.f32.mrf.mxu1  ;;  %v620_v37 = vadd.f32 %v619_v27, %v607_v36 }
  0xae   :  { %v633_v38 = vadd.f32 %v632_v28, %v620_v37 }
  0xb3   :  { %v621_v33 = vpop.f32.mrf.mxu2 }
  0xb4   :  { %v634_v34 = vpop.f32.mrf.mxu3 }
  0xc3   :  { %v645_v39 = vpop.f32.mrf.mxu0 }
  0xc4   :  { %v658_v40 = vpop.f32.mrf.mxu1  ;;  %v646_v41 = vadd.f32 %v645_v39, %v633_v38 }
  0xc6   :  { %v659_v42 = vadd.f32 %v658_v40, %v646_v41 }
  0xcb   :  { %v671_v43 = vpop.f32.mrf.mxu2  ;;  %v647_v46 = vpop.f32.mrf.mxu0 }
  0xcc   :  { %v684_v44 = vpop.f32.mrf.mxu3  ;;  %v672_v45 = vadd.f32 %v671_v43, %v659_v42  ;;  %v660_v47 = vpop.f32.mrf.mxu1 }
  0xce   :  { %v685_v48 = vadd.f32 %v684_v44, %v672_v45 }
  0xd0   :  { %v688_v49 = vmax.f32 %v685_v48, 0.0 }
  0xd2   :  { %v689_v50 = vpack.c.bf16 %v688_v49, %v688_v49 }
  0xd3   :  { %v673_v51 = vpop.f32.mrf.mxu2 }
  0xd4   :  { %v686_v52 = vpop.f32.mrf.mxu3  ;;  %766 = vmatmul.bf16.vlgmr.msra.gmra.mxu0 %v689_v50 }
 0x151   :  { %v767_v54 = vpop.f32.mrf.mxu0 }
 0x152   :  { %v768_v55 = vadd.f32 %v1155_v53, %v767_v54 }
 0x154   :  { %772 = vst.msk [vmem:[#allocation5] sm:$0x3] %vm771_vm0, %v768_v55 }
 0x155   :  { %783 = dma.vmem_to_hbm [thread:$0]  %s779_s21, 32, %s781_s24, [#allocation4]  }
 0x159   :  { %v769_v56 = vpop.f32.mrf.mxu0 }
 0x15a   :  { %1206 = dma.done.wait [#allocation4], 32  }
 0x15b   :  { %1207 = vsyncadd [#allocation4], 4294967264 }
 0x15c   :  { %788 = vsyncpa [#allocation3], 1 }
 0x15d   :  { %789 = vsyncpa [#allocation4], 1 }

</bundles_post_ra>
